<compile_context>
chip_gen: v6e
topology: v6e:2x2x1
jax: 0.10.0
libtpu: 0.0.40
codegen_flags: <defaults>
</compile_context>

<pallas_src>
import functools

import jax
import jax.numpy as jnp
from jax.experimental import pallas as pl
from jax.experimental.pallas import tpu as pltpu


def _round_up(n, m):
    return ((n + m - 1) // m) * m


# --------------------------------------------------------------------------- #
# Kernel
# --------------------------------------------------------------------------- #
def dblock_kernel(x_ref, wg_ref, bg_ref, wh_ref, bh_ref, mu_ref, ls_ref, *,
                  hidden_pad, out_pad):
    # x_ref : (TB, in)  f32/bf16     wg_ref: (in, 2*Hp)   bf16   bg_ref: (1, 2*Hp)  f32
    # wh_ref: (Hp, 2*Op) bf16        bh_ref: (1, 2*Op)    f32
    # mu_ref/ls_ref: (TB, Op) f32
    compute_dtype = wg_ref.dtype

    # Cast to bf16 inside the kernel: x is read from HBM exactly once.
    x = x_ref[...].astype(compute_dtype)

    # Fused gate matmul: one MXU push yields [fc1(x) | fc2(x)] with f32 accumulation.
    gates = jnp.dot(x, wg_ref[...], preferred_element_type=jnp.float32) + bg_ref[...]

    # hidden_pad is a multiple of 128 -> lane-aligned split, no relayout.
    g1 = gates[:, :hidden_pad]
    g2 = gates[:, hidden_pad:]
    # sigmoid(z) == 0.5 * (1 + tanh(z / 2)): single tanh-class EUP op per element
    # (cheaper than exp + divide; relevant on v5e's weak EUP).  All f32.
    t = (jnp.tanh(g1) * (0.5 * (1.0 + jnp.tanh(0.5 * g2)))).astype(compute_dtype)

    # Fused head matmul: [mu | logsigma] slab; out_pad is a multiple of 128 so the
    # split and both stores are lane-dense (unmasked vst).
    heads = jnp.dot(t, wh_ref[...], preferred_element_type=jnp.float32) + bh_ref[...]
    mu_ref[...] = heads[:, :out_pad].astype(mu_ref.dtype)
    ls_ref[...] = heads[:, out_pad:].astype(ls_ref.dtype)


# --------------------------------------------------------------------------- #
# Parameter packing (one-time prep)
# --------------------------------------------------------------------------- #
def pack_params(p, compute_dtype=jnp.bfloat16):
    """Pack + pad gate/head weights.

    Both packed halves are zero-padded to a 128-lane multiple.  Zero columns in
    w1/w2/b_gate give gate pre-activations of 0 -> tanh(0)=0 -> padded hidden
    units are exactly 0, and the matching w_head rows are zero anyway, so the
    padding never changes the result.
    """
    in_dim, hidden = p["w1"].shape
    out = p["w_mu"].shape[1]
    h_pad = _round_up(hidden, 128)
    o_pad = _round_up(out, 128)

    def pad_cols(w, n):
        return jnp.pad(w, ((0, 0), (0, n - w.shape[1])))

    def pad_rows(w, n):
        return jnp.pad(w, ((0, n - w.shape[0]), (0, 0)))

    w_gate = jnp.concatenate([pad_cols(p["w1"], h_pad), pad_cols(p["w2"], h_pad)], axis=1)
    b_gate = jnp.concatenate([pad_cols(p["b1"], h_pad), pad_cols(p["b2"], h_pad)], axis=1)
    w_head = jnp.concatenate(
        [pad_cols(pad_rows(p["w_mu"], h_pad), o_pad),
         pad_cols(pad_rows(p["w_ls"], h_pad), o_pad)], axis=1)
    b_head = jnp.concatenate([pad_cols(p["b_mu"], o_pad), pad_cols(p["b_ls"], o_pad)], axis=1)

    return {
        "w_gate": w_gate.astype(compute_dtype),   # (in, 2*Hp) bf16
        "b_gate": b_gate.astype(jnp.float32),     # (1, 2*Hp)  f32
        "w_head": w_head.astype(compute_dtype),   # (Hp, 2*Op) bf16
        "b_head": b_head.astype(jnp.float32),     # (1, 2*Op)  f32
        "input_size": in_dim,
        "hidden_pad": h_pad,
        "out_pad": o_pad,
        "output_size": out,
    }


# --------------------------------------------------------------------------- #
# Wrapper
# --------------------------------------------------------------------------- #
def _fit_tile_b(tb, in_dim, h_pad, o_pad, x_itemsize, w_bytes, vmem_limit,
                double_buffer_weights):
    """Shrink the batch tile until the rough VMEM footprint fits the budget."""
    budget = int(vmem_limit * 0.85)
    wbuf = w_bytes * (2 if double_buffer_weights else 1)
    while tb > 16:
        per_tile = (2 * tb * in_dim * x_itemsize   # x blocks (double-buffered)
                    + 2 * 2 * tb * o_pad * 4       # mu/logsigma blocks (double-buffered f32)
                    + tb * 2 * h_pad * 4           # gates intermediate (f32)
                    + tb * h_pad * 2)              # gated hidden t (bf16)
        if per_tile + wbuf <= budget:
            break
        tb = max(16, _round_up(tb // 2, 16))
    return tb


def dblock_forward(x, packed, *, tile_b=1024, vmem_limit_bytes=48 * 1024 * 1024,
                   single_buffer_weights=None):
    """x: (B, input_size) f32 (or bf16).  packed: pack_params output.

    Returns (mu, logsigma), each (B, output_size) f32.
    vmem_limit_bytes=48 MiB is safe on all generations (v7x has 64 MiB VMEM);
    on v5e/v6e raise it to ~96 MiB and use tile_b of 1024-2048.
    """
    B, in_dim = x.shape
    assert in_dim == packed["input_size"]
    h_pad = packed["hidden_pad"]
    o_pad = packed["out_pad"]
    out = packed["output_size"]
    two_h = 2 * h_pad
    two_o = 2 * o_pad

    w_bytes = (packed["w_gate"].size + packed["w_head"].size) * packed["w_gate"].dtype.itemsize \
        + (packed["b_gate"].size + packed["b_head"].size) * 4
    if single_buffer_weights is None:
        # Only worth single-buffering once the packed weights dominate VMEM.
        single_buffer_weights = w_bytes > (4 << 20)

    # Batch tile: multiple of 16 rows (bf16 sublane packing), clamped to budget.
    tb = max(16, min(_round_up(tile_b, 16), _round_up(B, 16)))
    tb = _fit_tile_b(tb, in_dim, h_pad, o_pad, x.dtype.itemsize, w_bytes,
                     vmem_limit_bytes, not single_buffer_weights)

    # cdiv grid: the tail block is handled by Pallas block masking (no jnp.pad copy).
    grid = (pl.cdiv(B, tb),)

    def resident_spec(shape):
        if single_buffer_weights:
            return pl.BlockSpec(shape, lambda i: (0, 0), pipeline_mode=pl.Buffered(1))
        return pl.BlockSpec(shape, lambda i: (0, 0))

    kernel = functools.partial(dblock_kernel, hidden_pad=h_pad, out_pad=o_pad)

    cost = pl.CostEstimate(
        flops=int(2 * B * in_dim * two_h + 2 * B * h_pad * two_o),
        transcendentals=int(2 * B * h_pad),
        bytes_accessed=int(B * in_dim * x.dtype.itemsize + w_bytes + 2 * B * o_pad * 4),
    )

    out_mu, out_ls = pl.pallas_call(
        kernel,
        out_shape=(
            jax.ShapeDtypeStruct((B, o_pad), jnp.float32),
            jax.ShapeDtypeStruct((B, o_pad), jnp.float32),
        ),
        grid=grid,
        in_specs=[
            pl.BlockSpec((tb, in_dim), lambda i: (i, 0)),   # x: tiled over batch, original dtype
            resident_spec((in_dim, two_h)),                 # packed gate weight (VMEM-resident)
            resident_spec((1, two_h)),                      # packed gate bias
            resident_spec((h_pad, two_o)),                  # packed head weight (VMEM-resident)
            resident_spec((1, two_o)),                      # packed head bias
        ],
        out_specs=(
            pl.BlockSpec((tb, o_pad), lambda i: (i, 0)),    # mu (lane-dense, 128-wide)
            pl.BlockSpec((tb, o_pad), lambda i: (i, 0)),    # logsigma
        ),
        compiler_params=pltpu.CompilerParams(
            dimension_semantics=("parallel",),
            vmem_limit_bytes=vmem_limit_bytes,
        ),
        cost_estimate=cost,
    )(x, packed["w_gate"], packed["b_gate"], packed["w_head"], packed["b_head"])

    # Only the lane-padding columns are dropped here; rows are already exact.
    return out_mu[:, :out], out_ls[:, :out]


# --------------------------------------------------------------------------- #
# Reference / init
# --------------------------------------------------------------------------- #
def init_params(key, input_size, hidden_size, output_size):
    """Matches nn.Linear init (uniform +-1/sqrt(fan_in)); weights stored as (in, out)."""
    ks = jax.random.split(key, 8)
    s_in = 1.0 / jnp.sqrt(input_size)
    s_h = 1.0 / jnp.sqrt(hidden_size)
    u = lambda k, shape, s: jax.random.uniform(k, shape, jnp.float32, -s, s)
    return {
        "w1": u(ks[0], (input_size, hidden_size), s_in),
        "b1": u(ks[1], (1, hidden_size), s_in),
        "w2": u(ks[2], (input_size, hidden_size), s_in),
        "b2": u(ks[3], (1, hidden_size), s_in),
        "w_mu": u(ks[4], (hidden_size, output_size), s_h),
        "b_mu": u(ks[5], (1, output_size), s_h),
        "w_ls": u(ks[6], (hidden_size, output_size), s_h),
        "b_ls": u(ks[7], (1, output_size), s_h),
    }


def dblock_reference(x, p):
    t = jnp.tanh(x @ p["w1"] + p["b1"]) * jax.nn.sigmoid(x @ p["w2"] + p["b2"])
    return t @ p["w_mu"] + p["b_mu"], t @ p["w_ls"] + p["b_ls"]


# --------------------------------------------------------------------------- #
# Demo / self-test
# --------------------------------------------------------------------------- #
if __name__ == "__main__":
    key = jax.random.PRNGKey(0)
    k_x, k_p, k_x2 = jax.random.split(key, 3)

    input_size, hidden_size, output_size = 16, 32, 8
    params = init_params(k_p, input_size, hidden_size, output_size)
    packed = pack_params(params)

    # Case 1: single full block.
    x = jax.random.normal(k_x, (16, input_size), jnp.float32)
    mu, logsigma = dblock_forward(x, packed)
    mu = jax.block_until_ready(mu)
    logsigma = jax.block_until_ready(logsigma)
    mu_ref, ls_ref = dblock_reference(x, params)
    assert mu.shape == (16, output_size) and logsigma.shape == (16, output_size)
    assert jnp.allclose(mu, mu_ref, atol=2e-2, rtol=2e-2)
    assert jnp.allclose(logsigma, ls_ref, atol=2e-2, rtol=2e-2)

    # Case 2: gridded batch with a non-divisible tail (exercises cdiv-grid masking).
    x2 = jax.random.normal(k_x2, (300, input_size), jnp.float32)
    mu2, ls2 = dblock_forward(x2, packed, tile_b=128)
    mu2 = jax.block_until_ready(mu2)
    ls2 = jax.block_until_ready(ls2)
    mu2_ref, ls2_ref = dblock_reference(x2, params)
    assert mu2.shape == (300, output_size) and ls2.shape == (300, output_size)
    assert jnp.allclose(mu2, mu2_ref, atol=2e-2, rtol=2e-2)
    assert jnp.allclose(ls2, ls2_ref, atol=2e-2, rtol=2e-2)

    print("KERNEL_OK")
</pallas_src>

<mosaic_0001>
module attributes {stable_mosaic.version = 11 : i64} {
  func.func @dblock_kernel(%arg0: i32, %arg1: memref<16x16xf32, #tpu.memory_space<vmem>>, %arg2: memref<16x256xbf16, #tpu.memory_space<vmem>>, %arg3: memref<1x256xf32, #tpu.memory_space<vmem>>, %arg4: memref<128x256xbf16, #tpu.memory_space<vmem>>, %arg5: memref<1x256xf32, #tpu.memory_space<vmem>>, %arg6: memref<16x128xf32, #tpu.memory_space<vmem>>, %arg7: memref<16x128xf32, #tpu.memory_space<vmem>>) attributes {dimension_semantics = [#tpu.dimension_semantics<parallel>], iteration_bounds = array<i64: 1>, scalar_prefetch = 0 : i64, scratch_operands = 0 : i64, tpu.core_type = #tpu.core_type<tc>, window_params = [{transform_indices = @transform_0, window_bounds = array<i64: 16, 16>}, {pipeline_mode = #tpu.pipeline_mode<synchronous>, transform_indices = @transform_1, window_bounds = array<i64: 16, 256>}, {pipeline_mode = #tpu.pipeline_mode<synchronous>, transform_indices = @transform_2, window_bounds = array<i64: 1, 256>}, {pipeline_mode = #tpu.pipeline_mode<synchronous>, transform_indices = @transform_3, window_bounds = array<i64: 128, 256>}, {pipeline_mode = #tpu.pipeline_mode<synchronous>, transform_indices = @transform_4, window_bounds = array<i64: 1, 256>}, {transform_indices = @transform_5, window_bounds = array<i64: 16, 128>}, {transform_indices = @transform_6, window_bounds = array<i64: 16, 128>}]} {
    %c0 = arith.constant 0 : index
    %c0_0 = arith.constant 0 : index
    %0 = vector.load %arg1[%c0, %c0_0] : memref<16x16xf32, #tpu.memory_space<vmem>>, vector<16x16xf32>
    %1 = arith.truncf %0 : vector<16x16xf32> to vector<16x16xbf16>
    %c0_1 = arith.constant 0 : index
    %c0_2 = arith.constant 0 : index
    %2 = vector.load %arg2[%c0_1, %c0_2] : memref<16x256xbf16, #tpu.memory_space<vmem>>, vector<16x256xbf16>
    %cst = arith.constant dense<0.000000e+00> : vector<16x256xf32>
    %3 = tpu.matmul %1, %2, %cst {dimension_numbers = #tpu.dot_dimension_numbers<[1], [0], [0], [1], [0, 0, 1, 1], [], []>} : vector<16x16xbf16>, vector<16x256xbf16>, vector<16x256xf32> -> vector<16x256xf32>
    %c0_3 = arith.constant 0 : index
    %c0_4 = arith.constant 0 : index
    %4 = vector.load %arg3[%c0_3, %c0_4] : memref<1x256xf32, #tpu.memory_space<vmem>>, vector<1x256xf32>
    %5 = vector.broadcast %4 : vector<1x256xf32> to vector<16x256xf32>
    %6 = arith.addf %3, %5 : vector<16x256xf32>
    %7 = vector.extract_strided_slice %6 {offsets = [0, 0], sizes = [16, 128], strides = [1, 1]} : vector<16x256xf32> to vector<16x128xf32>
    %8 = vector.extract_strided_slice %6 {offsets = [0, 128], sizes = [16, 128], strides = [1, 1]} : vector<16x256xf32> to vector<16x128xf32>
    %9 = math.tanh %7 : vector<16x128xf32>
    %cst_5 = arith.constant 5.000000e-01 : f32
    %10 = vector.broadcast %cst_5 : f32 to vector<16x128xf32>
    %11 = arith.mulf %10, %8 : vector<16x128xf32>
    %12 = math.tanh %11 : vector<16x128xf32>
    %cst_6 = arith.constant 1.000000e+00 : f32
    %13 = vector.broadcast %cst_6 : f32 to vector<16x128xf32>
    %14 = arith.addf %13, %12 : vector<16x128xf32>
    %cst_7 = arith.constant 5.000000e-01 : f32
    %15 = vector.broadcast %cst_7 : f32 to vector<16x128xf32>
    %16 = arith.mulf %15, %14 : vector<16x128xf32>
    %17 = arith.mulf %9, %16 : vector<16x128xf32>
    %18 = arith.truncf %17 : vector<16x128xf32> to vector<16x128xbf16>
    %c0_8 = arith.constant 0 : index
    %c0_9 = arith.constant 0 : index
    %19 = vector.load %arg4[%c0_8, %c0_9] : memref<128x256xbf16, #tpu.memory_space<vmem>>, vector<128x256xbf16>
    %cst_10 = arith.constant dense<0.000000e+00> : vector<16x256xf32>
    %20 = tpu.matmul %18, %19, %cst_10 {dimension_numbers = #tpu.dot_dimension_numbers<[1], [0], [0], [1], [0, 0, 1, 1], [], []>} : vector<16x128xbf16>, vector<128x256xbf16>, vector<16x256xf32> -> vector<16x256xf32>
    %c0_11 = arith.constant 0 : index
    %c0_12 = arith.constant 0 : index
    %21 = vector.load %arg5[%c0_11, %c0_12] : memref<1x256xf32, #tpu.memory_space<vmem>>, vector<1x256xf32>
    %22 = vector.broadcast %21 : vector<1x256xf32> to vector<16x256xf32>
    %23 = arith.addf %20, %22 : vector<16x256xf32>
    %24 = vector.extract_strided_slice %23 {offsets = [0, 0], sizes = [16, 128], strides = [1, 1]} : vector<16x256xf32> to vector<16x128xf32>
    %c0_13 = arith.constant 0 : index
    %c0_14 = arith.constant 0 : index
    %25 = vector.load %arg6[%c0_13, %c0_14] : memref<16x128xf32, #tpu.memory_space<vmem>>, vector<16x128xf32>
    tpu.vector_store %arg6[%c0_13, %c0_14], %24 {strides = array<i32>} : memref<16x128xf32, #tpu.memory_space<vmem>>, vector<16x128xf32>,
    %26 = vector.extract_strided_slice %23 {offsets = [0, 128], sizes = [16, 128], strides = [1, 1]} : vector<16x256xf32> to vector<16x128xf32>
    %c0_15 = arith.constant 0 : index
    %c0_16 = arith.constant 0 : index
    %27 = vector.load %arg7[%c0_15, %c0_16] : memref<16x128xf32, #tpu.memory_space<vmem>>, vector<16x128xf32>
    tpu.vector_store %arg7[%c0_15, %c0_16], %26 {strides = array<i32>} : memref<16x128xf32, #tpu.memory_space<vmem>>, vector<16x128xf32>,
    return
  }
  func.func @transform_0(%arg0: i32) -> (i32, i32) {
    %c0_i32 = arith.constant 0 : i32
    %c0_i32_0 = arith.constant 0 : i32
    return %arg0, %c0_i32 : i32, i32
  }
  func.func @transform_1(%arg0: i32) -> (i32, i32) {
    %c0_i32 = arith.constant 0 : i32
    %c0_i32_0 = arith.constant 0 : i32
    %c0_i32_1 = arith.constant 0 : i32
    return %c0_i32, %c0_i32_0 : i32, i32
  }
  func.func @transform_2(%arg0: i32) -> (i32, i32) {
    %c0_i32 = arith.constant 0 : i32
    %c0_i32_0 = arith.constant 0 : i32
    %c0_i32_1 = arith.constant 0 : i32
    return %c0_i32, %c0_i32_0 : i32, i32
  }
  func.func @transform_3(%arg0: i32) -> (i32, i32) {
    %c0_i32 = arith.constant 0 : i32
    %c0_i32_0 = arith.constant 0 : i32
    %c0_i32_1 = arith.constant 0 : i32
    return %c0_i32, %c0_i32_0 : i32, i32
  }
  func.func @transform_4(%arg0: i32) -> (i32, i32) {
    %c0_i32 = arith.constant 0 : i32
    %c0_i32_0 = arith.constant 0 : i32
    %c0_i32_1 = arith.constant 0 : i32
    return %c0_i32, %c0_i32_0 : i32, i32
  }
  func.func @transform_5(%arg0: i32) -> (i32, i32) {
    %c0_i32 = arith.constant 0 : i32
    %c0_i32_0 = arith.constant 0 : i32
    return %arg0, %c0_i32 : i32, i32
  }
  func.func @transform_6(%arg0: i32) -> (i32, i32) {
    %c0_i32 = arith.constant 0 : i32
    %c0_i32_0 = arith.constant 0 : i32
    return %arg0, %c0_i32 : i32, i32
  }
}

</mosaic_0001>

<bundles_post_ra>
// kernel: tpu_custom_call.1
= control target key start
LH: loop header
LB: loop body
LE: loop exit
PB: predicated region body
PF: predicated region fallthrough
CT: control target
= control target key end

     0   :  { %12 = vsyncpa [#allocation3], 0  ;;  %s591_s0 = inlined_call_operand.hbm [shape: f32[16,16], index: 0, kind: input, shape index: {}]   ;;  %s592_s1 = inlined_call_operand.hbm [shape: bf16[16,256], index: 1, kind: input, shape index: {}]   ;;  %s593_s2 = inlined_call_operand.vmem [shape: f32[1,256], index: 2, kind: input, shape index: {}]   ;;  %s594_s3 = inlined_call_operand.hbm [shape: bf16[128,256], index: 3, kind: input, shape index: {}]   ;;  %s595_s4 = inlined_call_operand.vmem [shape: f32[1,256], index: 4, kind: input, shape index: {}]   ;;  %s596_s5 = inlined_call_operand.hbm [shape: f32[16,128], index: 5, kind: output, shape index: {0}]   ;;  %s597_s6 = inlined_call_operand.hbm [shape: f32[16,128], index: 6, kind: output, shape index: {1}]  }
   0x1   :  { %13 = vsyncpa [#allocation6], 0 }
   0x2   :  { %14 = vsyncpa [#allocation4], 0 }
   0x3   :  { %15 = vsyncpa [#allocation10], 0  ;;  %s512_s21 = smov [#allocation5]   ;;  %s513_s23 = smov [#allocation2]  }
   0x4   :  { %s33_s22 = sshll.u32 %s512_s21, 4  ;;  %s21_s24 = sshll.u32 %s513_s23, 4  ;;  %s34_s22 = int_to_ptr.vmem [resolvable:$true] %s33_s22  ;;  %s22_s24 = int_to_ptr.vmem [resolvable:$true] %s21_s24 }
   0x5   :  { %s412_s25 = scalar_lea.vmem %s34_s22, 256  ;;  %p417_p1 = scmp.lt.s32.totalorder %s34_s22, %s34_s22 }
   0x6   :  { %p413_p0 = scmp.ne.s32.totalorder %s34_s22, %s412_s25  ;;  %p418_p2 = scmp.lt.s32.totalorder %s412_s25, %s412_s25 }
   0x8   :  { %p419_p3 = por %p418_p2, %p417_p1 }
   0xa   :  { %p420_p4 = pnand %p419_p3, %p413_p0 }
   0xc   :  { %423 = shalt.err (!%p420_p4)
}
   0xd   :  { %s514_s26 = smov 128   ;;  %s515_s27 = smov 8  }
   0xe   :  { %39 = dma.hbm_to_vmem [thread:$0]  %s592_s1, 256, %s34_s22, [#allocation6], %s514_s26, %s514_s26, %s515_s27  }
   0xf   :  { %s432_s30 = scalar_lea.vmem %s22_s24, 256  ;;  %p437_p6 = scmp.lt.s32.totalorder %s22_s24, %s22_s24 }
  0x10   :  { %p433_p5 = scmp.ne.s32.totalorder %s22_s24, %s432_s30  ;;  %p438_p7 = scmp.lt.s32.totalorder %s432_s30, %s432_s30 }
  0x12   :  { %p439_p8 = por %p438_p7, %p437_p6 }
  0x14   :  { %p440_p9 = pnand %p439_p8, %p433_p5 }
  0x16   :  { %443 = shalt.err (!%p440_p9)
}
  0x17   :  { %27 = dma.hbm_to_vmem [thread:$0]  %s591_s0, 256, %s22_s24, [#allocation3], %s514_s26, %s514_s26, %s515_s27  }
  0x18   :  { %s516_s9 = smov [#allocation7]  }
  0x19   :  { %s47_s10 = sshll.u32 %s516_s9, 4  ;;  %s48_s10 = int_to_ptr.vmem [resolvable:$true] %s47_s10 }
  0x1a   :  { %s452_s11 = scalar_lea.vmem %s48_s10, 2048  ;;  %p457_p11 = scmp.lt.s32.totalorder %s48_s10, %s48_s10 }
  0x1b   :  { %p453_p10 = scmp.ne.s32.totalorder %s48_s10, %s452_s11  ;;  %p458_p12 = scmp.lt.s32.totalorder %s452_s11, %s452_s11 }
  0x1d   :  { %p459_p13 = por %p458_p12, %p457_p11 }
  0x1f   :  { %p460_p0 = pnand %p459_p13, %p453_p10 }
  0x21   :  { %463 = shalt.err (!%p460_p0)
}
  0x22   :  { %53 = dma.hbm_to_vmem [thread:$0]  %s594_s3, 2048, %s48_s10, [#allocation6], %s514_s26, %s514_s26, %s515_s27  }
  0x23   :  { %504 = dma.done.wait [#allocation3], 256  }
  0x24   :  { %505 = vsyncadd [#allocation3], 4294967040 }
  0x25   :  { %506 = dma.done.wait [#allocation6], 2304  }
  0x26   :  { %507 = vsyncadd [#allocation6], 4294964992  ;;  %v517_v0 = vmov 0   ;;  %v369_v1 = vld [vmem:[#allocation5 + $0x4] ss:$8 sps:$4 sm:$0xff]   ;;  %v66_v3 = vld [vmem:[#allocation2] sm:$0xff]  ;;  %v73_v22 = vlaneseq }
  0x27   :  { %129 = vmatprep.mubr.bf16.mxu0 %v517_v0  ;;  %293 = vmatprep.mubr.bf16.mxu1 %v517_v0  ;;  %v371_v2 = vld [vmem:[#allocation5] ss:$8 sps:$4 sm:$0xff]   ;;  %v67_v4 = vld [vmem:[#allocation2 + $0x8] sm:$0xff]  ;;  %vm93_vm0 = vcmask 130048   ;;  %v372_v6 = vld [vmem:[#allocation7 + $0x74] ss:$8 sps:$4 sm:$0xff]  }
  0x28   :  { %111 = vmatprep.subr.bf16.mxu0 %v369_v1  ;;  %v68_v5 = vpack.c.bf16 %v67_v4, %v66_v3  ;;  %v374_v7 = vld [vmem:[#allocation7 + $0x70] ss:$8 sps:$4 sm:$0xff]   ;;  %261 = vmatprep.subr.bf16.mxu1 %v372_v6  ;;  %v375_v8 = vld [vmem:[#allocation7 + $0x64] ss:$8 sps:$4 sm:$0xff]   ;;  %v377_v9 = vld [vmem:[#allocation7 + $0x60] ss:$8 sps:$4 sm:$0xff]  }
  0x29   :  { %112 = vmatpush1.bf16.msra.mxu0 %v371_v2  ;;  %262 = vmatpush1.bf16.msra.mxu1 %v374_v7  ;;  %v378_v10 = vld [vmem:[#allocation7 + $0x54] ss:$8 sps:$4 sm:$0xff]   ;;  %v380_v11 = vld [vmem:[#allocation7 + $0x50] ss:$8 sps:$4 sm:$0xff]   ;;  %v381_v12 = vld [vmem:[#allocation7 + $0x44] ss:$8 sps:$4 sm:$0xff]  }
  0x2a   :  { %263 = vmatprep.subr.bf16.mxu1 %v375_v8  ;;  %v383_v13 = vld [vmem:[#allocation7 + $0x40] ss:$8 sps:$4 sm:$0xff]   ;;  %v384_v14 = vld [vmem:[#allocation7 + $0x34] ss:$8 sps:$4 sm:$0xff]   ;;  %v386_v15 = vld [vmem:[#allocation7 + $0x30] ss:$8 sps:$4 sm:$0xff]  }
  0x2b   :  { %v387_v16 = vld [vmem:[#allocation7 + $0x24] ss:$8 sps:$4 sm:$0xff]   ;;  %v389_v17 = vld [vmem:[#allocation7 + $0x20] ss:$8 sps:$4 sm:$0xff]   ;;  %v390_v18 = vld [vmem:[#allocation7 + $0x14] ss:$8 sps:$4 sm:$0xff]  }
  0x2c   :  { %344 = vmatmul.mubr.msk.bf16.vlgmr.msra.gmra.mxu0 %vm93_vm0, %v68_v5  ;;  %v392_v19 = vld [vmem:[#allocation7 + $0x10] ss:$8 sps:$4 sm:$0xff]   ;;  %v393_v20 = vld [vmem:[#allocation7 + $0x4] ss:$8 sps:$4 sm:$0xff]   ;;  %v395_v21 = vld [vmem:[#allocation7] ss:$8 sps:$4 sm:$0xff]  }
  0x2d   :  { %264 = vmatpush1.bf16.msra.mxu1 %v377_v9  ;;  %v74_v23 = vshrl.u32 %v73_v22, 7  ;;  %v71_v25 = vld [vmem:[%s593_s2] sm:$0x3]  ;;  %s518_s14 = smov [#allocation8]   ;;  %s519_s16 = smov [#allocation9]  }
  0x2e   :  { %265 = vmatprep.subr.bf16.mxu1 %v378_v10  ;;  %v169_v50 = vld [vmem:[%s595_s4] sm:$0x3]  ;;  %s313_s15 = sshll.u32 %s518_s14, 4  ;;  %s325_s17 = sshll.u32 %s519_s16, 4  ;;  %s314_s15 = int_to_ptr.vmem [resolvable:$true] %s313_s15  ;;  %s326_s17 = int_to_ptr.vmem [resolvable:$true] %s325_s17 }
  0x2f   :  { %v79_v24 = vsub.s32 1, %v74_v23  ;;  %v75_v28 = vsub.s32 0, %v74_v23  ;;  %s464_s4 = scalar_lea.vmem %s314_s15, 256  ;;  %p469_p2 = scmp.lt.s32.totalorder %s314_s15, %s314_s15 }
  0x30   :  { %p465_p1 = scmp.ne.s32.totalorder %s314_s15, %s464_s4  ;;  %p470_p3 = scmp.lt.s32.totalorder %s464_s4, %s464_s4 }
  0x31   :  { %266 = vmatpush1.bf16.msra.mxu1 %v380_v11  ;;  %v80_v26 = vrot.slane %v71_v25, %v79_v24  ;;  %v76_v33 = vrot.slane %v71_v25, %v75_v28  ;;  %v174_v51 = vrot.slane %v169_v50, %v75_v28  ;;  %v178_v52 = vrot.slane %v169_v50, %v79_v24 }
  0x32   :  { %267 = vmatprep.subr.bf16.mxu1 %v381_v12  ;;  %p471_p4 = por %p470_p3, %p469_p2 }
  0x34   :  { %p472_p5 = pnand %p471_p4, %p465_p1 }
  0x35   :  { %268 = vmatpush1.bf16.msra.mxu1 %v383_v13 }
  0x36   :  { %269 = vmatprep.subr.bf16.mxu1 %v384_v14 }
  0x39   :  { %270 = vmatpush1.bf16.msra.mxu1 %v386_v15 }
  0x3a   :  { %271 = vmatprep.subr.bf16.mxu1 %v387_v16 }
  0x3d   :  { %272 = vmatpush1.bf16.msra.mxu1 %v389_v17 }
  0x3e   :  { %273 = vmatprep.subr.bf16.mxu1 %v390_v18 }
  0x41   :  { %274 = vmatpush1.bf16.msra.mxu1 %v392_v19 }
  0x42   :  { %275 = vmatprep.subr.bf16.mxu1 %v393_v20 }
  0x45   :  { %276 = vmatpush1.bf16.msra.mxu1 %v395_v21 }
  0xec   :  { %v131_v27 = vpop.f32.mrf.mxu0 }
  0xed   :  { %v132_v37 = vadd.f32 %v131_v27, %v76_v33 }
  0xee   :  { %v133_v29 = vpop.f32.mrf.mxu0 }
  0xef   :  { %v134_v30 = vadd.f32 %v133_v29, %v80_v26 }
  0xf0   :  { %v135_v31 = vpop.f32.mrf.mxu0 }
  0xf1   :  { %v142_v32 = vmul.f32 0.5, %v134_v30  ;;  %v136_v38 = vadd.f32 %v135_v31, %v76_v33 }
  0xf2   :  { %v137_v34 = vpop.f32.mrf.mxu0 }
  0xf3   :  { %396 = vtanh.f32 %v142_v32  ;;  %v138_v35 = vadd.f32 %v137_v34, %v80_v26 }
  0xf5   :  { %v143_v36 = vmul.f32 0.5, %v138_v35 }
  0xf7   :  { %398 = vtanh.f32 %v143_v36 }
  0xf8   :  { %400 = vtanh.f32 %v132_v37 }
  0xf9   :  { %402 = vtanh.f32 %v136_v38 }
 0x100   :  { %v397_v39 = vpop.eup %396 }
 0x101   :  { %v146_v40 = vadd.f32 1.0, %v397_v39 }
 0x103   :  { %v148_v42 = vmul.f32 0.5, %v146_v40 }
 0x104   :  { %v399_v41 = vpop.eup %398 }
 0x105   :  { %v147_v43 = vadd.f32 1.0, %v399_v41  ;;  %v401_v44 = vpop.eup %400 }
 0x106   :  { %v403_v46 = vpop.eup %402  ;;  %v150_v47 = vmul.f32 %v401_v44, %v148_v42 }
 0x107   :  { %v149_v45 = vmul.f32 0.5, %v147_v43 }
 0x109   :  { %v151_v48 = vmul.f32 %v403_v46, %v149_v45 }
 0x10b   :  { %v152_v49 = vpack.c.bf16 %v151_v48, %v150_v47 }
 0x10d   :  { %294 = vmatmul.mubr.bf16.vlgmr.msra.gmra.mxu1 %v152_v49 }
 0x1cd   :  { %v295_v53 = vpop.f32.mrf.mxu1 }
 0x1ce   :  { %v296_v54 = vadd.f32 %v295_v53, %v174_v51 }
 0x1cf   :  { %v297_v55 = vpop.f32.mrf.mxu1 }
 0x1d0   :  { %304 = vst [vmem:[#allocation8] sm:$0xff] %v296_v54  ;;  %v298_v56 = vadd.f32 %v297_v55, %v178_v52 }
 0x1d1   :  { %v299_v57 = vpop.f32.mrf.mxu1 }
 0x1d2   :  { %306 = vst [vmem:[#allocation9] sm:$0xff] %v298_v56  ;;  %v300_v58 = vadd.f32 %v299_v57, %v174_v51 }
 0x1d3   :  { %v301_v59 = vpop.f32.mrf.mxu1 }
 0x1d4   :  { %305 = vst [vmem:[#allocation8 + $0x8] sm:$0xff] %v300_v58  ;;  %v302_v60 = vadd.f32 %v301_v59, %v178_v52 }
 0x1d5   :  { %475 = shalt.err (!%p472_p5)
}
 0x1d6   :  { %319 = dma.vmem_to_hbm [thread:$0]  %s314_s15, 256, %s596_s5, [#allocation4], %s514_s26, %s514_s26, %s515_s27   ;;  %307 = vst [vmem:[#allocation9 + $0x8] sm:$0xff] %v302_v60 }
 0x1d7   :  { %s484_s20 = scalar_lea.vmem %s326_s17, 256  ;;  %p489_p7 = scmp.lt.s32.totalorder %s326_s17, %s326_s17 }
 0x1d8   :  { %p485_p6 = scmp.ne.s32.totalorder %s326_s17, %s484_s20  ;;  %p490_p8 = scmp.lt.s32.totalorder %s484_s20, %s484_s20 }
 0x1da   :  { %p491_p9 = por %p490_p8, %p489_p7 }
 0x1dc   :  { %p492_p10 = pnand %p491_p9, %p485_p6 }
 0x1de   :  { %495 = shalt.err (!%p492_p10)
}
 0x1df   :  { %331 = dma.vmem_to_hbm [thread:$0]  %s326_s17, 256, %s597_s6, [#allocation10], %s514_s26, %s514_s26, %s515_s27  }
 0x1e0   :  { %508 = dma.done.wait [#allocation4], 256  }
 0x1e1   :  { %509 = vsyncadd [#allocation4], 4294967040 }
 0x1e2   :  { %510 = dma.done.wait [#allocation10], 256  }
 0x1e3   :  { %511 = vsyncadd [#allocation10], 4294967040 }
 0x1e4   :  { %338 = vsyncpa [#allocation3], 1 }
 0x1e5   :  { %339 = vsyncpa [#allocation6], 1 }
 0x1e6   :  { %340 = vsyncpa [#allocation4], 1 }
 0x1e7   :  { %341 = vsyncpa [#allocation10], 1 }

</bundles_post_ra>
